<compile_context>
chip_gen: v5e
topology: v5e:2x2
jax: 0.10.0
libtpu: 0.0.40
codegen_flags: <defaults>
</compile_context>

<pallas_src>
import math

import jax
import jax.numpy as jnp
from jax.experimental import pallas as pl
from jax.experimental.pallas import tpu as pltpu

_BLOCK_BYTES = 4 * 1024 * 1024      # ~4 MiB per block buffer
_TARGET_STEPS = 8                   # aim for >= 8 grid steps (pipeline / 2 TCs)
_VMEM_LIMIT_BYTES = 32 * 1024 * 1024


def _round_up(a: int, b: int) -> int:
    return ((a + b - 1) // b) * b


def _h_swish_kernel(x_ref, o_ref):
    # Upcast to f32 for the intermediate (matches PyTorch opmath for bf16/f16;
    # identical for f32).  Divide by 6 (not mul by rounded 1/6) for parity.
    x = x_ref[...].astype(jnp.float32)
    y = x * (jnp.clip(x + 3.0, 0.0, 6.0) / 6.0)
    o_ref[...] = y.astype(o_ref.dtype)


def h_swish(x):
    """h_swish forward. x: any-shape float array (e.g. (N, C, H, W))."""
    orig_shape = x.shape
    dtype = x.dtype
    total = math.prod(orig_shape) if orig_shape else 1
    if total == 0:
        return x

    itemsize = jnp.dtype(dtype).itemsize
    sub = max(8, 32 // itemsize)            # sublane multiple (8/16/32)

    # Pick the widest lane-dense last dim that divides total -> zero-copy view.
    L = None
    for cand in (512, 256, 128):
        if total % cand == 0:
            L = cand
            break

    if L is not None:
        needs_pad = False
        rows = total // L
        x2d = x.reshape(rows, L)
    else:
        # Ragged tail: pad by at most one (sub, 128) tile; hint XLA to fuse
        # the pad into the pallas_call input instead of materializing it.
        needs_pad = True
        L = 128
        padded_total = _round_up(total, L * sub)
        rows = padded_total // L
        x2d = jnp.pad(x.reshape(-1), (0, padded_total - total)).reshape(rows, L)

    # Row-tile selection: dtype-aware sublane rounding, ~4 MiB byte budget,
    # and enough grid steps to keep the DMA pipeline / both TensorCores busy.
    max_rows = max(sub, (_BLOCK_BYTES // (L * itemsize)) // sub * sub)
    if rows <= sub:
        tr = rows                           # full-extent block (legal layout)
    else:
        tr = _round_up(pl.cdiv(rows, _TARGET_STEPS), sub)
        tr = min(tr, max_rows)
    grid = pl.cdiv(rows, tr)                # partial last block handled by Pallas

    cost = pl.CostEstimate(
        flops=4 * total,
        transcendentals=0,
        bytes_accessed=2 * total * itemsize,
    )

    compiler_params = pltpu.CompilerParams(
        dimension_semantics=("parallel",),
        vmem_limit_bytes=_VMEM_LIMIT_BYTES,
        allow_input_fusion=[True] if needs_pad else None,
    )

    out2d = pl.pallas_call(
        _h_swish_kernel,
        out_shape=jax.ShapeDtypeStruct((rows, L), dtype),
        grid=(grid,),
        in_specs=[pl.BlockSpec((tr, L), lambda i: (i, 0))],
        out_specs=pl.BlockSpec((tr, L), lambda i: (i, 0)),
        compiler_params=compiler_params,
        cost_estimate=cost,
    )(x2d)

    if needs_pad:
        return out2d.reshape(-1)[:total].reshape(orig_shape)
    return out2d.reshape(orig_shape)


def _h_swish_ref(x):
    xf = x.astype(jnp.float32)
    return (xf * jnp.clip(xf + 3.0, 0.0, 6.0) / 6.0).astype(x.dtype)


if __name__ == "__main__":
    key = jax.random.PRNGKey(0)

    # Main case (matches the module's typical NCHW activations): zero-copy path.
    x = jax.random.normal(key, (2, 4, 16, 16), dtype=jnp.float32) * 4.0
    y = jax.block_until_ready(h_swish(x))
    assert y.shape == x.shape and y.dtype == x.dtype
    assert jnp.allclose(y, _h_swish_ref(x), atol=1e-5, rtol=1e-5)

    # Ragged spatial size (7x7): exercises the small-pad + input-fusion path.
    x2 = jax.random.normal(jax.random.PRNGKey(0), (2, 3, 7, 7), dtype=jnp.float32) * 4.0
    y2 = jax.block_until_ready(h_swish(x2))
    assert jnp.allclose(y2, _h_swish_ref(x2), atol=1e-5, rtol=1e-5)

    # Larger-but-small shape that yields a multi-step parallel grid.
    x3 = jax.random.normal(jax.random.PRNGKey(0), (2, 8, 32, 32), dtype=jnp.float32) * 4.0
    y3 = jax.block_until_ready(h_swish(x3))
    assert jnp.allclose(y3, _h_swish_ref(x3), atol=1e-5, rtol=1e-5)

    # bf16: intermediate computed in f32 (opmath parity with PyTorch).
    x4 = (jax.random.normal(jax.random.PRNGKey(0), (2, 4, 16, 16), dtype=jnp.float32) * 4.0
          ).astype(jnp.bfloat16)
    y4 = jax.block_until_ready(h_swish(x4))
    assert y4.dtype == jnp.bfloat16
    assert jnp.allclose(y4.astype(jnp.float32), _h_swish_ref(x4).astype(jnp.float32),
                        atol=2e-2, rtol=2e-2)

    print("KERNEL_OK")
</pallas_src>

<mosaic_0001>
module attributes {stable_mosaic.version = 11 : i64} {
  func.func @_h_swish_kernel(%arg0: i32, %arg1: memref<4x512xf32, #tpu.memory_space<vmem>>, %arg2: memref<4x512xf32, #tpu.memory_space<vmem>>) attributes {dimension_semantics = [#tpu.dimension_semantics<parallel>], iteration_bounds = array<i64: 1>, scalar_prefetch = 0 : i64, scratch_operands = 0 : i64, tpu.core_type = #tpu.core_type<tc>, window_params = [{transform_indices = @transform_0, window_bounds = array<i64: 4, 512>}, {transform_indices = @transform_1, window_bounds = array<i64: 4, 512>}]} {
    %c0 = arith.constant 0 : index
    %c0_0 = arith.constant 0 : index
    %0 = vector.load %arg1[%c0, %c0_0] : memref<4x512xf32, #tpu.memory_space<vmem>>, vector<4x512xf32>
    %cst = arith.constant 3.000000e+00 : f32
    %1 = vector.broadcast %cst : f32 to vector<4x512xf32>
    %2 = arith.addf %0, %1 : vector<4x512xf32>
    %cst_1 = arith.constant 0.000000e+00 : f32
    %cst_2 = arith.constant 6.000000e+00 : f32
    %3 = vector.broadcast %cst_1 : f32 to vector<4x512xf32>
    %4 = arith.maximumf %3, %2 : vector<4x512xf32>
    %5 = vector.broadcast %cst_2 : f32 to vector<4x512xf32>
    %6 = arith.minimumf %5, %4 : vector<4x512xf32>
    %cst_3 = arith.constant 6.000000e+00 : f32
    %7 = vector.broadcast %cst_3 : f32 to vector<4x512xf32>
    %8 = arith.divf %6, %7 : vector<4x512xf32>
    %9 = arith.mulf %0, %8 : vector<4x512xf32>
    %c0_4 = arith.constant 0 : index
    %c0_5 = arith.constant 0 : index
    %10 = vector.load %arg2[%c0_4, %c0_5] : memref<4x512xf32, #tpu.memory_space<vmem>>, vector<4x512xf32>
    tpu.vector_store %arg2[%c0_4, %c0_5], %9 {strides = array<i32>} : memref<4x512xf32, #tpu.memory_space<vmem>>, vector<4x512xf32>,
    return
  }
  func.func @transform_0(%arg0: i32) -> (i32, i32) {
    %c0_i32 = arith.constant 0 : i32
    %c0_i32_0 = arith.constant 0 : i32
    return %arg0, %c0_i32 : i32, i32
  }
  func.func @transform_1(%arg0: i32) -> (i32, i32) {
    %c0_i32 = arith.constant 0 : i32
    %c0_i32_0 = arith.constant 0 : i32
    return %arg0, %c0_i32 : i32, i32
  }
}

</mosaic_0001>

<bundles_post_ra>
// kernel: tpu_custom_call.1
= control target key start
LH: loop header
LB: loop body
LE: loop exit
PB: predicated region body
PF: predicated region fallthrough
CT: control target
= control target key end

     0   :  { %6 = vsyncpa [#allocation3], 0  ;;  %s137_s0 = inlined_call_operand.hbm [shape: f32[4,512], index: 0, kind: input, shape index: {}]   ;;  %s138_s1 = inlined_call_operand.hbm [shape: f32[4,512], index: 1, kind: output, shape index: {}]  }
   0x1   :  { %7 = vsyncpa [#allocation4], 0  ;;  %s13_s8 = sshll.u32 %s137_s0, 4  ;;  %s118_s9 = smov [#allocation2]   ;;  %s14_s8 = int_to_ptr.hbm [resolvable:$true] %s13_s8 }
   0x2   :  { %s15_s10 = sshll.u32 %s118_s9, 4  ;;  %s16_s10 = int_to_ptr.vmem [resolvable:$true] %s15_s10 }
   0x3   :  { %18 = dma.hbm_to_vmem [thread:$0]  %s14_s8, 256, %s16_s10, [#allocation3]  }
   0x4   :  { %114 = dma.done.wait [#allocation3], 256  }
   0x5   :  { %115 = vsyncadd [#allocation3], 4294967040  ;;  %v119_v0 = vmov 6.0   ;;  %v23_v2 = vld [vmem:[#allocation2] sm:$0xff]  ;;  %v24_v3 = vld [vmem:[#allocation2 + $0x8] sm:$0xff]  ;;  %s120_s0 = smov [#allocation5]  }
   0x6   :  { %64 = vrcp.f32 %v119_v0  ;;  %v25_v4 = vadd.f32 3.0, %v23_v2  ;;  %v26_v6 = vadd.f32 3.0, %v24_v3  ;;  %s49_s11 = sshll.u32 %s120_s0, 4  ;;  %s51_s14 = sshll.u32 %s138_s1, 4  ;;  %s50_s11 = int_to_ptr.vmem [resolvable:$true] %s49_s11  ;;  %s52_s14 = int_to_ptr.hbm [resolvable:$true] %s51_s14 }
   0x8   :  { %v27_v7 = vmax.f32 %v25_v4, 0.0  ;;  %v28_v9 = vmax.f32 %v26_v6, 0.0 }
   0xa   :  { %v29_v11 = vmin.f32 %v27_v7, 6.0  ;;  %v30_v12 = vmin.f32 %v28_v9, 6.0 }
   0xc   :  { %v65_v1 = vpop.eup %64 }
   0xd   :  { %v32_v5 = vmul.f32 6.0, %v65_v1  ;;  %vm36_vm0 = vweird.f32 %v65_v1 }
   0xf   :  { %v33_v8 = vsub.f32 1.0, %v32_v5 }
  0x11   :  { %v34_v10 = vmul.f32 %v65_v1, %v33_v8 }
  0x13   :  { %v35_v13 = vadd.f32 %v65_v1, %v34_v10 }
  0x15   :  { %v37_v14 = vsel %vm36_vm0, %v65_v1, %v35_v13 }
  0x16   :  { %v38_v15 = vmul.f32 %v37_v14, %v29_v11  ;;  %v39_v16 = vmul.f32 %v37_v14, %v30_v12 }
  0x18   :  { %v40_v17 = vmul.f32 %v38_v15, %v23_v2  ;;  %v41_v18 = vmul.f32 %v39_v16, %v24_v3 }
  0x1a   :  { %42 = vst [vmem:[#allocation5] sm:$0xff] %v40_v17 }
  0x1b   :  { %43 = vst [vmem:[#allocation5 + $0x8] sm:$0xff] %v41_v18 }
  0x1c   :  { %54 = dma.vmem_to_hbm [thread:$0]  %s50_s11, 256, %s52_s14, [#allocation4]  }
  0x1d   :  { %116 = dma.done.wait [#allocation4], 256  }
  0x1e   :  { %117 = vsyncadd [#allocation4], 4294967040 }
  0x1f   :  { %59 = vsyncpa [#allocation3], 1 }
  0x20   :  { %60 = vsyncpa [#allocation4], 1 }

</bundles_post_ra>
